<compile_context>
chip_gen: v7x
topology: tpu7x:2x2x1
jax: 0.10.0
libtpu: 0.0.40
codegen_flags: <defaults>
</compile_context>

<pallas_src>
import functools
import math

import jax
import jax.numpy as jnp
from jax import lax
from jax.experimental import pallas as pl
from jax.experimental.pallas import tpu as pltpu

_MIB = 1024 * 1024


def _cdiv(a, b):
    return -(-a // b)


def _round_up(a, b):
    return _cdiv(a, b) * b


def _tpu_params():
    """Best-effort (num_tensorcores, per_core_vmem_bytes).

    Falls back to (1, 64 MiB): single-TC behaviour (no forced grid split) and
    the smallest per-TC VMEM of any supported generation.  Always safe, merely
    conservative if the introspection API is unavailable.
    """
    num_cores = 1
    vmem_bytes = 64 * _MIB
    try:
        info = pltpu.get_tpu_info()
        for attr in ("vmem_capacity_bytes", "vmem_size_bytes", "vmem_bytes"):
            v = getattr(info, attr, None)
            if v:
                vmem_bytes = int(v)
                break
        for attr in ("num_tensorcores", "tensorcores_per_chip", "num_cores",
                     "cores_per_chip", "core_count"):
            v = getattr(info, attr, None)
            if v:
                num_cores = int(v)
                break
    except Exception:
        pass
    return num_cores, vmem_bytes


def _rmsnorm_kernel(x_ref, w_ref, o_ref, *, eps, inv_scale):
    # x_ref: (block_rows, dim), w_ref: (1, dim) float32, o_ref: (block_rows, dim)
    x = x_ref[...].astype(jnp.float32)
    sumsq = jnp.sum(x * x, axis=-1, keepdims=True)
    # Reference: norm = sqrt(sumsq) * dim**-0.5 ; out = x / max(norm, eps) * w
    # Equivalent: inv = min(rsqrt(sumsq) * sqrt(dim), 1/eps) ; out = x * inv * w
    # rsqrt lowers to the EUP (its own VLIW slot); rsqrt(0) = inf is clamped by
    # the min, matching the reference's eps clamp.
    # NOTE: in a ragged tail block the out-of-bounds rows contain whatever was
    # in VMEM (NOT zeros) -- that is fine only because the reduction is
    # strictly per-row and OOB-row writes are dropped by Pallas.
    inv_norm = jnp.minimum(lax.rsqrt(sumsq) * inv_scale, 1.0 / eps)
    o_ref[...] = (x * inv_norm * w_ref[...]).astype(o_ref.dtype)


def _rmsnorm_xla(x, weight, *, eps):
    dim = x.shape[-1]
    xf = x.astype(jnp.float32)
    norm = jnp.sqrt(jnp.sum(xf * xf, axis=-1, keepdims=True)) * dim ** (-0.5)
    out = xf / jnp.maximum(norm, eps) * weight.astype(jnp.float32)
    return out.astype(x.dtype)


def rmsnorm(x, weight, *, eps=1e-8, block_rows=1024):
    """RMSNorm over the last axis of x. weight has shape (dim,)."""
    dim = x.shape[-1]
    lead_shape = x.shape[:-1]
    rows = int(math.prod(lead_shape)) if lead_shape else 1

    # Lane-density guard: the Pallas path streams (rows, dim) tiles with dim on
    # the lane axis.  dim not a multiple of 128 means every vld/vst is a masked
    # partial store (down to 25% lane utilization at dim=32) -- worse than
    # letting XLA handle it.  Real RMSNorm hidden sizes are multiples of 128.
    if dim % 128 != 0 or rows == 0:
        return _rmsnorm_xla(x, weight, eps=eps)

    x2d = x.reshape(rows, dim)
    # Pre-cast the weight once on the host: the (1, dim) block is resident in
    # VMEM across all grid steps, so casting per-step inside the kernel would
    # redo the unpack every iteration.
    w2d = weight.astype(jnp.float32).reshape(1, dim)

    itemsize = jnp.dtype(x2d.dtype).itemsize
    # Row granularity for clean sublane packing: 8 (f32) / 16 (bf16) / 32 (i8).
    gran = max(8, 32 // itemsize)

    num_cores, vmem_cap = _tpu_params()

    # Generation-aware budgets:
    #  * 128 MiB-VMEM parts (v5e/v6e): big tiles are free -> ~56 MiB pipelined
    #    working set, scoped limit up to ~96 MiB.
    #  * 64 MiB-VMEM parts (v7x): keep headroom -> ~18 MiB budget, 40 MiB limit.
    if vmem_cap >= 96 * _MIB:
        ws_budget = 56 * _MIB
        limit_cap = 96 * _MIB
    else:
        ws_budget = 18 * _MIB
        limit_cap = 40 * _MIB

    # Honest per-tile working-set estimate:
    #   double-buffered input  : 2 * br * dim * itemsize
    #   double-buffered output : 2 * br * dim * itemsize
    #   f32 upcast of x + f32 pre-cast product : 2 * br * dim * 4
    #   margin for Mosaic internal scratch / resident weight : ~2 MiB
    def est_tile_bytes(br):
        return 4 * br * dim * itemsize + 2 * br * dim * 4 + 2 * _MIB

    per_row_bytes = dim * (4 * itemsize + 8)
    max_br_budget = max(gran, (ws_budget - 2 * _MIB) // per_row_bytes)
    br = max(gran, (min(block_rows, max_br_budget) // gran) * gran)

    rows_up = _round_up(rows, gran)
    br = min(br, rows_up)

    # Megacore (v7x, 2 TCs): keep the ("parallel",) row grid a multiple of the
    # core count so both cores get equal work.  On single-TC parts the grid is
    # a serial loop, so forcing extra steps only adds ~0.35 us/step overhead --
    # skip it there.
    if num_cores > 1 and rows_up >= num_cores * gran:
        nsteps = _cdiv(rows, br)
        if nsteps % num_cores != 0:
            nsteps = _round_up(nsteps, num_cores)
            br = max(gran, _round_up(_cdiv(rows, nsteps), gran))

    grid = (_cdiv(rows, br),)

    # est_tile_bytes already includes the double buffering -- no extra 2x.
    vmem_limit = int(min(limit_cap, max(16 * _MIB, est_tile_bytes(br))))

    cost = pl.CostEstimate(
        flops=4 * rows * dim,               # square, reduce-add, 2 scale muls
        transcendentals=rows,               # one rsqrt per row
        bytes_accessed=2 * rows * dim * itemsize + dim * 4,
    )

    kernel = functools.partial(
        _rmsnorm_kernel, eps=float(eps), inv_scale=float(dim) ** 0.5)

    out2d = pl.pallas_call(
        kernel,
        out_shape=jax.ShapeDtypeStruct((rows, dim), x.dtype),
        grid_spec=pltpu.PrefetchScalarGridSpec(
            num_scalar_prefetch=0,
            grid=grid,
            in_specs=[
                # Streaming row tiles of x (ragged tail handled by Pallas:
                # OOB-row reads are garbage but only feed per-row results whose
                # writes are dropped).
                pl.BlockSpec((br, dim), lambda i: (i, 0)),
                # Weight: same (1, dim) f32 block every step -> VMEM-resident.
                pl.BlockSpec((1, dim), lambda i: (0, 0)),
            ],
            out_specs=pl.BlockSpec((br, dim), lambda i: (i, 0)),
        ),
        compiler_params=pltpu.CompilerParams(
            dimension_semantics=("parallel",),
            vmem_limit_bytes=vmem_limit,
        ),
        cost_estimate=cost,
    )(x2d, w2d)

    return out2d.reshape(*lead_shape, dim)


def rmsnorm_reference(x, weight, *, eps=1e-8):
    dim = x.shape[-1]
    xf = x.astype(jnp.float32)
    norm = jnp.linalg.norm(xf, axis=-1, keepdims=True) * dim ** (-0.5)
    out = xf / jnp.maximum(norm, eps) * weight.astype(jnp.float32)
    return out.astype(x.dtype)


if __name__ == "__main__":
    key = jax.random.PRNGKey(0)
    k1, k2, k3, k4 = jax.random.split(key, 4)

    # Case 1: shapes implied by the module (batch, seq, hidden=32), f32.
    # dim=32 is not lane-dense -> exercises the XLA fallback guard.
    batch, seq, hidden = 2, 8, 32
    x1 = jax.random.normal(k1, (batch, seq, hidden), dtype=jnp.float32)
    w1 = jnp.ones((hidden,), jnp.float32) + 0.01 * jnp.arange(
        hidden, dtype=jnp.float32)
    out1 = jax.block_until_ready(rmsnorm(x1, w1, eps=1e-8))
    ref1 = rmsnorm_reference(x1, w1, eps=1e-8)
    assert out1.shape == x1.shape
    assert jnp.allclose(out1, ref1, atol=1e-4, rtol=1e-4), "mismatch (dim=32)"

    # Case 2: lane-dense hidden=128, f32, Pallas path, single block.
    hidden2 = 128
    x2 = jax.random.normal(k2, (2, 8, hidden2), dtype=jnp.float32)
    w2 = jnp.ones((hidden2,), jnp.float32) + 0.01 * jnp.arange(
        hidden2, dtype=jnp.float32)
    out2 = jax.block_until_ready(rmsnorm(x2, w2, eps=1e-8))
    ref2 = rmsnorm_reference(x2, w2, eps=1e-8)
    assert out2.shape == x2.shape
    assert jnp.allclose(out2, ref2, atol=1e-4, rtol=1e-4), "mismatch (f32)"

    # Case 3: ragged row count with a small forced block -> multi-step grid and
    # a partial tail block (no host-side padding round trip).
    x3 = jax.random.normal(k3, (3, 5, hidden2), dtype=jnp.float32)
    out3 = jax.block_until_ready(rmsnorm(x3, w2, eps=1e-8, block_rows=8))
    ref3 = rmsnorm_reference(x3, w2, eps=1e-8)
    assert out3.shape == x3.shape
    assert jnp.allclose(out3, ref3, atol=1e-4, rtol=1e-4), "mismatch (ragged)"

    # Case 4: bf16 input, hidden=256 (16-row sublane granularity path).
    hidden4 = 256
    x4 = jax.random.normal(k4, (4, 8, hidden4), dtype=jnp.bfloat16)
    w4 = (jnp.ones((hidden4,), jnp.float32)
          + 0.01 * jnp.arange(hidden4, dtype=jnp.float32)).astype(jnp.bfloat16)
    out4 = jax.block_until_ready(rmsnorm(x4, w4, eps=1e-8))
    ref4 = rmsnorm_reference(x4, w4, eps=1e-8)
    assert out4.shape == x4.shape
    assert jnp.allclose(out4.astype(jnp.float32), ref4.astype(jnp.float32),
                        atol=2e-2, rtol=2e-2), "mismatch (bf16)"

    print("KERNEL_OK")
</pallas_src>

<mosaic_0001>
module attributes {stable_mosaic.version = 11 : i64} {
  func.func @_rmsnorm_kernel(%arg0: i32, %arg1: memref<16x128xf32, #tpu.memory_space<vmem>>, %arg2: memref<1x128xf32, #tpu.memory_space<vmem>>, %arg3: memref<16x128xf32, #tpu.memory_space<vmem>>) attributes {dimension_semantics = [#tpu.dimension_semantics<parallel>], iteration_bounds = array<i64: 1>, scalar_prefetch = 0 : i64, scratch_operands = 0 : i64, tpu.core_type = #tpu.core_type<tc>, window_params = [{transform_indices = @transform_0, window_bounds = array<i64: 16, 128>}, {pipeline_mode = #tpu.pipeline_mode<synchronous>, transform_indices = @transform_1, window_bounds = array<i64: 1, 128>}, {transform_indices = @transform_2, window_bounds = array<i64: 16, 128>}]} {
    %c0 = arith.constant 0 : index
    %c0_0 = arith.constant 0 : index
    %0 = vector.load %arg1[%c0, %c0_0] : memref<16x128xf32, #tpu.memory_space<vmem>>, vector<16x128xf32>
    %1 = arith.mulf %0, %0 : vector<16x128xf32>
    %cst = arith.constant dense<0.000000e+00> : vector<16xf32>
    %2 = vector.multi_reduction <add>, %1, %cst [1] : vector<16x128xf32> to vector<16xf32>
    %3 = vector.shape_cast %2 : vector<16xf32> to vector<16x1xf32>
    %4 = math.rsqrt %3 : vector<16x1xf32>
    %cst_1 = arith.constant 11.3137083 : f32
    %5 = vector.broadcast %cst_1 : f32 to vector<16x1xf32>
    %6 = arith.mulf %4, %5 : vector<16x1xf32>
    %cst_2 = arith.constant 1.000000e+08 : f32
    %7 = vector.broadcast %cst_2 : f32 to vector<16x1xf32>
    %8 = arith.minimumf %6, %7 : vector<16x1xf32>
    %9 = vector.broadcast %8 : vector<16x1xf32> to vector<16x128xf32>
    %10 = arith.mulf %0, %9 : vector<16x128xf32>
    %c0_3 = arith.constant 0 : index
    %c0_4 = arith.constant 0 : index
    %11 = vector.load %arg2[%c0_3, %c0_4] : memref<1x128xf32, #tpu.memory_space<vmem>>, vector<1x128xf32>
    %12 = vector.broadcast %11 : vector<1x128xf32> to vector<16x128xf32>
    %13 = arith.mulf %10, %12 : vector<16x128xf32>
    %c0_5 = arith.constant 0 : index
    %c0_6 = arith.constant 0 : index
    %14 = vector.load %arg3[%c0_5, %c0_6] : memref<16x128xf32, #tpu.memory_space<vmem>>, vector<16x128xf32>
    tpu.vector_store %arg3[%c0_5, %c0_6], %13 {strides = array<i32>} : memref<16x128xf32, #tpu.memory_space<vmem>>, vector<16x128xf32>,
    return
  }
  func.func @transform_0(%arg0: i32) -> (i32, i32) {
    %c0_i32 = arith.constant 0 : i32
    %c0_i32_0 = arith.constant 0 : i32
    return %arg0, %c0_i32 : i32, i32
  }
  func.func @transform_1(%arg0: i32) -> (i32, i32) {
    %c0_i32 = arith.constant 0 : i32
    %c0_i32_0 = arith.constant 0 : i32
    %c0_i32_1 = arith.constant 0 : i32
    return %c0_i32, %c0_i32_0 : i32, i32
  }
  func.func @transform_2(%arg0: i32) -> (i32, i32) {
    %c0_i32 = arith.constant 0 : i32
    %c0_i32_0 = arith.constant 0 : i32
    return %arg0, %c0_i32 : i32, i32
  }
}

</mosaic_0001>

<bundles_post_ra>
// kernel: tpu_custom_call.1
= control target key start
LH: loop header
LB: loop body
LE: loop exit
PB: predicated region body
PF: predicated region fallthrough
CT: control target
= control target key end

     0   :  { %7 = vsyncpa [#allocation3], 0  ;;  %s179_s0 = inlined_call_operand.hbm [shape: f32[16,128], index: 0, kind: input, shape index: {}]   ;;  %s180_s1 = inlined_call_operand.vmem [shape: f32[1,128], index: 1, kind: input, shape index: {}]   ;;  %s181_s2 = inlined_call_operand.hbm [shape: f32[16,128], index: 2, kind: output, shape index: {}]  }
   0x1   :  { %8 = vsyncpa [#allocation4], 0  ;;  %s127_s9 = smov [#allocation2]   ;;  %s79_s13 = scalar_lea.hbm %s179_s0, 256 }
   0x2   :  { %s14_s10 = sshll.u32 %s127_s9, 4  ;;  %p80_p0 = scmp.ne.s32.totalorder %s179_s0, %s79_s13  ;;  %s15_s10 = int_to_ptr.vmem [resolvable:$true] %s14_s10 }
   0x3   :  { %p83_p1 = scmp.lt.u32.totalorder %s79_s13, %s179_s0 }
   0x5   :  { %p85_p2 = pnand %p83_p1, %p80_p0 }
   0x7   :  { %88 = shalt.err (!%p85_p2)
}
   0x8   :  { %s89_s18 = scalar_lea.vmem %s15_s10, 256  ;;  %p94_p4 = scmp.lt.s32.totalorder %s15_s10, %s15_s10 }
   0x9   :  { %p90_p3 = scmp.ne.s32.totalorder %s15_s10, %s89_s18  ;;  %p95_p5 = scmp.lt.s32.totalorder %s89_s18, %s89_s18 }
   0xb   :  { %p96_p6 = por %p95_p5, %p94_p4 }
   0xd   :  { %p97_p7 = pnand %p96_p6, %p90_p3 }
   0xf   :  { %100 = shalt.err (!%p97_p7)
}
  0x10   :  { %s128_s19 = smov 128   ;;  %s129_s20 = smov 8  }
  0x11   :  { %20 = dma.hbm_to_vmem [thread:$0]  %s179_s0, 256, %s15_s10, [#allocation3], %s128_s19, %s128_s19, %s129_s20  }
  0x12   :  { %123 = dma.done.wait [#allocation3], 256  }
  0x13   :  { %124 = vsyncadd [#allocation3], 4294967040  ;;  %v26_v0 = vld [vmem:[#allocation2] sm:$0xff]  ;;  %v27_v1 = vld [vmem:[#allocation2 + $0x8] sm:$0xff]  ;;  %s130_s0 = smov [#allocation5]  }
  0x14   :  { %v28_v2 = vmul.f32 %v26_v0, %v26_v0  ;;  %v29_v3 = vmul.f32 %v27_v1, %v27_v1  ;;  %v70_v10 = vld [vmem:[%s180_s1] ss:$0 sm:$0xff]  ;;  %s58_s25 = sshll.u32 %s130_s0, 4  ;;  %s59_s25 = int_to_ptr.vmem [resolvable:$true] %s58_s25 }
  0x15   :  { %s101_s26 = scalar_lea.vmem %s59_s25, 256  ;;  %p106_p9 = scmp.lt.s32.totalorder %s59_s25, %s59_s25 }
  0x16   :  { %30 = vadd.xlane.f32.xlu0 %v28_v2  ;;  %p102_p8 = scmp.ne.s32.totalorder %s59_s25, %s101_s26  ;;  %p107_p10 = scmp.lt.s32.totalorder %s101_s26, %s101_s26 }
  0x18   :  { %p108_p11 = por %p107_p10, %p106_p9 }
  0x1a   :  { %32 = vadd.xlane.f32.xlu0 %v29_v3  ;;  %p109_p12 = pnand %p108_p11, %p102_p8 }
  0xa3   :  { %v31_v4 = vpop.xlane.xlu0 %30 }
  0xa4   :  { %75 = vrsqrt.f32 %v31_v4 }
  0xa7   :  { %v33_v5 = vpop.xlane.xlu0 %32 }
  0xa8   :  { %77 = vrsqrt.f32 %v33_v5 }
  0xae   :  { %v76_v6 = vpop.eup %75 }
  0xaf   :  { %v36_v7 = vmul.f32 11.313708, %v76_v6 }
  0xb1   :  { %v38_v8 = vmin.f32 %v36_v7, 1e+08 }
  0xb2   :  { %v78_v9 = vpop.eup %77 }
  0xb3   :  { %v40_v11 = vmul.f32 %v38_v8, %v26_v0  ;;  %v37_v12 = vmul.f32 11.313708, %v78_v9 }
  0xb5   :  { %v39_v13 = vmin.f32 %v37_v12, 1e+08  ;;  %v49_v14 = vmul.f32 %v70_v10, %v40_v11 }
  0xb7   :  { %v41_v15 = vmul.f32 %v39_v13, %v27_v1  ;;  %51 = vst [vmem:[#allocation5] sm:$0xff] %v49_v14 }
  0xb9   :  { %v50_v16 = vmul.f32 %v70_v10, %v41_v15 }
  0xbb   :  { %52 = vst [vmem:[#allocation5 + $0x8] sm:$0xff] %v50_v16 }
  0xbc   :  { %112 = shalt.err (!%p109_p12)
}
  0xbd   :  { %s113_s28 = scalar_lea.hbm %s181_s2, 256 }
  0xbe   :  { %p114_p13 = scmp.ne.s32.totalorder %s181_s2, %s113_s28  ;;  %p117_p0 = scmp.lt.u32.totalorder %s113_s28, %s181_s2 }
  0xc0   :  { %p119_p1 = pnand %p117_p0, %p114_p13 }
  0xc2   :  { %122 = shalt.err (!%p119_p1)
}
  0xc3   :  { %64 = dma.vmem_to_hbm [thread:$0]  %s59_s25, 256, %s181_s2, [#allocation4], %s128_s19, %s128_s19, %s129_s20  }
  0xc4   :  { %125 = dma.done.wait [#allocation4], 256  }
  0xc5   :  { %126 = vsyncadd [#allocation4], 4294967040 }
  0xc6   :  { %68 = vsyncpa [#allocation3], 1 }
  0xc7   :  { %69 = vsyncpa [#allocation4], 1 }

</bundles_post_ra>
